<compile_context>
chip_gen: v6e
topology: v6e:2x2x1
jax: 0.10.0
libtpu: 0.0.40
codegen_flags: <defaults>
</compile_context>

<pallas_src>
import jax
import jax.numpy as jnp
from jax.experimental import pallas as pl
from jax.experimental.pallas import tpu as pltpu


def _bias_row(b_ref, n_classes):
    """Rebuild the [1, C] bias row from C scalars sitting in SMEM (VPU selects)."""
    col = jax.lax.broadcasted_iota(jnp.int32, (1, n_classes), 1)
    bias = jnp.zeros((1, n_classes), jnp.float32)
    for c in range(n_classes):          # n_classes is static (4): unrolled selects
        bias = jnp.where(col == c, b_ref[c], bias)
    return bias


def _logits_kernel(x_ref, w_ref, b_ref, out_ref):
    """out[B, C] = X[B, F] @ W[F, C] + b[C]  (natural layout, single block)."""
    x = x_ref[...]                                               # [B, F]
    w = w_ref[...]                                               # [F, C]
    acc = jnp.dot(x, w, preferred_element_type=jnp.float32)      # MXU, [B, C]
    out_ref[...] = (acc + _bias_row(b_ref, b_ref.shape[0])).astype(out_ref.dtype)


def _softmax_kernel(x_ref, w_ref, b_ref, out_ref):
    """out[B, C] = softmax(X @ W + b, axis=1), fused in one pass."""
    x = x_ref[...]
    w = w_ref[...]
    logits = jnp.dot(x, w, preferred_element_type=jnp.float32)   # [B, C]
    logits = logits + _bias_row(b_ref, b_ref.shape[0])
    m = jnp.max(logits, axis=1, keepdims=True)                   # XLU, [B, 1]
    e = jnp.exp(logits - m)                                      # EUP
    denom = jnp.sum(e, axis=1, keepdims=True)                    # XLU, [B, 1]
    out_ref[...] = (e * pl.reciprocal(denom, approx=False)).astype(out_ref.dtype)


_VMEM_SPEC = pl.BlockSpec(memory_space=pltpu.MemorySpace.VMEM)
_SMEM_SPEC = pl.BlockSpec(memory_space=pltpu.MemorySpace.SMEM)


def _call(kernel, X, W, b, *, transcendentals):
    batch, n_features = X.shape
    n_features_w, n_classes = W.shape
    assert n_features == n_features_w
    assert b.shape == (n_classes,)

    itemsize = 4
    cost = pl.CostEstimate(
        flops=2 * batch * n_features * n_classes + batch * n_classes,
        transcendentals=transcendentals,
        bytes_accessed=itemsize * (X.size + W.size + b.size + batch * n_classes),
    )

    return pl.pallas_call(
        kernel,
        out_shape=jax.ShapeDtypeStruct((batch, n_classes), jnp.float32),
        # No grid: single full-array block, no pipeline bookkeeping.
        in_specs=[_VMEM_SPEC,      # X  [B, F]
                  _VMEM_SPEC,      # W  [F, C]
                  _SMEM_SPEC],     # b  [C]   (scalars; no padded VMEM tile DMA)
        out_specs=_VMEM_SPEC,      # out [B, C] in its natural layout
        cost_estimate=cost,
    )(X, W, b)


@jax.jit
def logistic_regression_forward(X, W, b):
    """X @ W + b (raw logits), matching LogisticRegression.forward."""
    return _call(_logits_kernel, X, W, b, transcendentals=0)


@jax.jit
def logistic_regression_predict_proba(X, W, b):
    """softmax(X @ W + b, axis=1), fused into a single kernel."""
    batch = X.shape[0]
    n_classes = W.shape[1]
    return _call(_softmax_kernel, X, W, b,
                 transcendentals=(n_classes + 1) * batch)


@jax.jit
def logistic_regression_predict(X, W, b):
    """argmax over classes of the kernel-computed logits."""
    return jnp.argmax(logistic_regression_forward(X, W, b), axis=1)


if __name__ == "__main__":
    # Shapes implied by the module's usage: X = rand(300, 10), a few classes.
    batch, n_features, n_classes = 300, 10, 4

    key = jax.random.PRNGKey(0)
    kx, kw = jax.random.split(key)

    X = jax.random.uniform(kx, (batch, n_features), dtype=jnp.float32)
    W = jax.random.normal(kw, (n_features, n_classes), dtype=jnp.float32)
    b = jnp.ones((n_classes,), dtype=jnp.float32)

    # forward: logits
    logits = jax.block_until_ready(logistic_regression_forward(X, W, b))
    ref_logits = X @ W + b
    assert logits.shape == (batch, n_classes)
    assert jnp.allclose(logits, ref_logits, atol=1e-4, rtol=1e-4)

    # predict_proba: fused softmax kernel
    probs = jax.block_until_ready(logistic_regression_predict_proba(X, W, b))
    ref_probs = jax.nn.softmax(ref_logits, axis=1)
    assert probs.shape == (batch, n_classes)
    assert jnp.allclose(probs, ref_probs, atol=1e-4, rtol=1e-4)

    # predict: argmax of kernel logits
    preds = jax.block_until_ready(logistic_regression_predict(X, W, b))
    assert jnp.array_equal(preds, jnp.argmax(ref_logits, axis=1))

    print("KERNEL_OK")
</pallas_src>

<mosaic_0001>
module attributes {stable_mosaic.version = 11 : i64} {
  func.func @_logits_kernel(%arg0: memref<300x10xf32, #tpu.memory_space<vmem>>, %arg1: memref<10x4xf32, #tpu.memory_space<vmem>>, %arg2: memref<4xf32, #tpu.memory_space<smem>>, %arg3: memref<300x4xf32, #tpu.memory_space<vmem>>) attributes {dimension_semantics = [], scalar_prefetch = 0 : i64, scratch_operands = 0 : i64, tpu.core_type = #tpu.core_type<tc>} {
    %c0 = arith.constant 0 : index
    %c0_0 = arith.constant 0 : index
    %0 = vector.load %arg0[%c0, %c0_0] : memref<300x10xf32, #tpu.memory_space<vmem>>, vector<300x10xf32>
    %c0_1 = arith.constant 0 : index
    %c0_2 = arith.constant 0 : index
    %1 = vector.load %arg1[%c0_1, %c0_2] : memref<10x4xf32, #tpu.memory_space<vmem>>, vector<10x4xf32>
    %cst = arith.constant dense<0.000000e+00> : vector<300x4xf32>
    %2 = tpu.matmul %0, %1, %cst {dimension_numbers = #tpu.dot_dimension_numbers<[1], [0], [0], [1], [0, 0, 1, 1], [], []>} : vector<300x10xf32>, vector<10x4xf32>, vector<300x4xf32> -> vector<300x4xf32>
    %3 = tpu.iota {dimensions = array<i32: 1>} : vector<1x4xi32>
    %cst_3 = arith.constant 0.000000e+00 : f32
    %4 = vector.broadcast %cst_3 : f32 to vector<1x4xf32>
    %c0_i32 = arith.constant 0 : i32
    %5 = vector.broadcast %c0_i32 : i32 to vector<1x4xi32>
    %6 = arith.cmpi eq, %3, %5 : vector<1x4xi32>
    %c0_4 = arith.constant 0 : index
    %7 = memref.load %arg2[%c0_4] : memref<4xf32, #tpu.memory_space<smem>>
    %8 = vector.broadcast %7 : f32 to vector<1x4xf32>
    %9 = arith.select %6, %8, %4 : vector<1x4xi1>, vector<1x4xf32>
    %c1_i32 = arith.constant 1 : i32
    %10 = vector.broadcast %c1_i32 : i32 to vector<1x4xi32>
    %11 = arith.cmpi eq, %3, %10 : vector<1x4xi32>
    %c1 = arith.constant 1 : index
    %12 = memref.load %arg2[%c1] : memref<4xf32, #tpu.memory_space<smem>>
    %13 = vector.broadcast %12 : f32 to vector<1x4xf32>
    %14 = arith.select %11, %13, %9 : vector<1x4xi1>, vector<1x4xf32>
    %c2_i32 = arith.constant 2 : i32
    %15 = vector.broadcast %c2_i32 : i32 to vector<1x4xi32>
    %16 = arith.cmpi eq, %3, %15 : vector<1x4xi32>
    %c2 = arith.constant 2 : index
    %17 = memref.load %arg2[%c2] : memref<4xf32, #tpu.memory_space<smem>>
    %18 = vector.broadcast %17 : f32 to vector<1x4xf32>
    %19 = arith.select %16, %18, %14 : vector<1x4xi1>, vector<1x4xf32>
    %c3_i32 = arith.constant 3 : i32
    %20 = vector.broadcast %c3_i32 : i32 to vector<1x4xi32>
    %21 = arith.cmpi eq, %3, %20 : vector<1x4xi32>
    %c3 = arith.constant 3 : index
    %22 = memref.load %arg2[%c3] : memref<4xf32, #tpu.memory_space<smem>>
    %23 = vector.broadcast %22 : f32 to vector<1x4xf32>
    %24 = arith.select %21, %23, %19 : vector<1x4xi1>, vector<1x4xf32>
    %25 = vector.broadcast %24 : vector<1x4xf32> to vector<300x4xf32>
    %26 = arith.addf %2, %25 : vector<300x4xf32>
    %c0_5 = arith.constant 0 : index
    %c0_6 = arith.constant 0 : index
    %27 = vector.load %arg3[%c0_5, %c0_6] : memref<300x4xf32, #tpu.memory_space<vmem>>, vector<300x4xf32>
    tpu.vector_store %arg3[%c0_5, %c0_6], %26 {strides = array<i32>} : memref<300x4xf32, #tpu.memory_space<vmem>>, vector<300x4xf32>,
    return
  }
}

</mosaic_0001>

<bundles_post_ra>
// kernel: logistic_regression_forward.1
= control target key start
LH: loop header
LB: loop body
LE: loop exit
PB: predicated region body
PF: predicated region fallthrough
CT: control target
= control target key end

     0   :  { %8 = vsyncpa [#allocation3], 0  ;;  %s1039_s0 = inlined_call_operand.vmem [shape: f32[300,10], index: 0, kind: input, shape index: {}]   ;;  %s1040_s1 = inlined_call_operand.vmem [shape: f32[10,4], index: 1, kind: input, shape index: {}]   ;;  %s1041_s2 = inlined_call_operand.vmem [shape: f32[4], index: 2, kind: input, shape index: {}]   ;;  %s1042_s3 = inlined_call_operand.vmem [shape: f32[300,4], index: 3, kind: output, shape index: {}]  }
   0x1   :  { %s19_s14 = sshll.u32 %s1041_s2, 4  ;;  %s20_s14 = int_to_ptr.vmem [resolvable:$true] %s19_s14 }
   0x2   :  { %s652_s15 = scalar_lea.vmem %s20_s14, 16  ;;  %p657_p1 = scmp.lt.s32.totalorder %s20_s14, %s20_s14 }
   0x3   :  { %p653_p0 = scmp.ne.s32.totalorder %s20_s14, %s652_s15  ;;  %p658_p2 = scmp.lt.s32.totalorder %s652_s15, %s652_s15 }
   0x5   :  { %p659_p3 = por %p658_p2, %p657_p1 }
   0x7   :  { %p660_p4 = pnand %p659_p3, %p653_p0 }
   0x9   :  { %663 = shalt.err (!%p660_p4)
}
   0xa   :  { %s666_s16 = smov [#allocation2]  }
   0xb   :  { %22 = dma.vmem_to_smem %s20_s14, 16, %s666_s16, [#allocation3]  }
   0xc   :  { %664 = dma.done.wait [#allocation3], 16  }
   0xd   :  { %665 = vsyncadd [#allocation3], 4294967280 }
   0xe   :  { %26 = sfence }
   0xf   :  { %v66_v0 = vld [vmem:[%s1040_s1 + $0x8] sm:$0x3]  ;;  %vm200_vm0 = vcmask 1041408   ;;  %v65_v1 = vld [vmem:[%s1040_s1] sm:$0xff]  ;;  %vm85_vm1 = vcmask 80896   ;;  %v29_v5 = vld [vmem:[%s1039_s0 + $0x10] sm:$0xff]  ;;  %v67_v40 = vlaneseq }
  0x10   :  { %v27_v2 = vld [vmem:[%s1039_s0] sm:$0xff]  ;;  %586 = vmatprep.subr.msk.mxu0 %vm200_vm0, %v66_v0  ;;  %647 = vmatprep.subr.msk.mxu1 %vm200_vm0, %v66_v0  ;;  %v28_v3 = vld [vmem:[%s1039_s0 + $0x8] sm:$0xff]  ;;  %v49_v7 = vld [vmem:[%s1039_s0 + $0xb0] sm:$0xff]  ;;  %s70_s10 = sld [smem:[#allocation2]]  ;;  %vm459_vm6 = vcmask 31744   ;;  %vm497_vm7 = vcmask 27648  }
  0x11   :  { %587 = vmatpush3.msk.msra.mxu0 %vm200_vm0, %v66_v0  ;;  %649 = vmatpush3.msk.msra.mxu1 %vm200_vm0, %v66_v0  ;;  %v47_v4 = vld [vmem:[%s1039_s0 + $0xa0] sm:$0xff]  ;;  %v48_v6 = vld [vmem:[%s1039_s0 + $0xa8] sm:$0xff]  ;;  %v30_v8 = vld [vmem:[%s1039_s0 + $0x18] sm:$0xff]  ;;  %s504_s11 = sld [smem:[#allocation2 + $0x1]]  ;;  %v68_v41 = vand.u32 127, %v67_v40 }
  0x12   :  { %588 = vmatprep.subr.mxu0 %v65_v1  ;;  %590 = vmatprep.mubr.msk.f32.mxu0 %vm85_vm1, %v27_v2  ;;  %v31_v9 = vld [vmem:[%s1039_s0 + $0x20] sm:$0xff]  ;;  %v50_v10 = vld [vmem:[%s1039_s0 + $0xb8] sm:$0xff]  ;;  %v32_v12 = vld [vmem:[%s1039_s0 + $0x28] sm:$0xff]  ;;  %s505_s12 = sld [smem:[#allocation2 + $0x2]] }
  0x13   :  { %589 = vmatpush3.msra.mxu0 %v65_v1  ;;  %648 = vmatprep.subr.mxu1 %v65_v1  ;;  %v51_v11 = vld [vmem:[%s1039_s0 + $0xc0] sm:$0xff]  ;;  %v33_v13 = vld [vmem:[%s1039_s0 + $0x30] sm:$0xff]  ;;  %v52_v14 = vld [vmem:[%s1039_s0 + $0xc8] sm:$0xff]  ;;  %vm69_vm2 = vcmp.eq.s32.totalorder %v68_v41, 0  ;;  %s506_s13 = sld [smem:[#allocation2 + $0x3]]  ;;  %vm73_vm3 = vcmp.eq.s32.totalorder %v68_v41, 1 }
  0x14   :  { %591 = vmatmul.mubr.msk.f32.vlgmr.msra.gmra.mxu0 %vm85_vm1, %v28_v3  ;;  %650 = vmatpush3.msra.mxu1 %v65_v1  ;;  %v53_v15 = vld [vmem:[%s1039_s0 + $0xd0] sm:$0xff]  ;;  %v34_v16 = vld [vmem:[%s1039_s0 + $0x38] sm:$0xff]  ;;  %v35_v17 = vld [vmem:[%s1039_s0 + $0x40] sm:$0xff]  ;;  %vm77_vm4 = vcmp.eq.s32.totalorder %v68_v41, 2  ;;  %vm81_vm5 = vcmp.eq.s32.totalorder %v68_v41, 3 }
  0x15   :  { %620 = vmatprep.mubr.msk.f32.mxu1 %vm85_vm1, %v47_v4  ;;  %593 = vmatprep.mubr.msk.f32.mxu0 %vm85_vm1, %v29_v5  ;;  %v54_v18 = vld [vmem:[%s1039_s0 + $0xd8] sm:$0xff]  ;;  %v55_v19 = vld [vmem:[%s1039_s0 + $0xe0] sm:$0xff]  ;;  %v36_v20 = vld [vmem:[%s1039_s0 + $0x48] sm:$0xff] }
  0x16   :  { %621 = vmatmul.mubr.msk.f32.vlgmr.msra.gmra.mxu1 %vm85_vm1, %v48_v6  ;;  %v37_v21 = vld [vmem:[%s1039_s0 + $0x50] sm:$0xff]  ;;  %v56_v22 = vld [vmem:[%s1039_s0 + $0xe8] sm:$0xff]  ;;  %v38_v24 = vld [vmem:[%s1039_s0 + $0x58] sm:$0xff]  ;;  %v71_v42 = vstv %s70_s10 }
  0x17   :  { %623 = vmatprep.mubr.msk.f32.mxu1 %vm85_vm1, %v49_v7  ;;  %v57_v23 = vld [vmem:[%s1039_s0 + $0xf0] sm:$0xff]  ;;  %v39_v25 = vld [vmem:[%s1039_s0 + $0x60] sm:$0xff]  ;;  %v58_v26 = vld [vmem:[%s1039_s0 + $0xf8] sm:$0xff]  ;;  %v72_v43 = vsel %vm69_vm2, %v71_v42, 0.0  ;;  %v75_v44 = vstv %s504_s11 }
  0x18   :  { %594 = vmatmul.mubr.msk.f32.gmra.mxu0 %vm85_vm1, %v30_v8  ;;  %v59_v27 = vld [vmem:[%s1039_s0 + $0x100] sm:$0xff]  ;;  %v40_v28 = vld [vmem:[%s1039_s0 + $0x68] sm:$0xff]  ;;  %v41_v29 = vld [vmem:[%s1039_s0 + $0x70] sm:$0xff]  ;;  %v76_v45 = vsel %vm73_vm3, %v75_v44, %v72_v43  ;;  %v79_v46 = vstv %s505_s12 }
  0x19   :  { %596 = vmatprep.mubr.msk.f32.mxu0 %vm85_vm1, %v31_v9  ;;  %v60_v30 = vld [vmem:[%s1039_s0 + $0x108] sm:$0xff]  ;;  %v61_v31 = vld [vmem:[%s1039_s0 + $0x110] sm:$0xff]  ;;  %v42_v32 = vld [vmem:[%s1039_s0 + $0x78] sm:$0xff]  ;;  %v80_v47 = vsel %vm77_vm4, %v79_v46, %v76_v45  ;;  %v83_v48 = vstv %s506_s13 }
  0x1a   :  { %624 = vmatmul.mubr.msk.f32.gmra.mxu1 %vm85_vm1, %v50_v10  ;;  %v43_v33 = vld [vmem:[%s1039_s0 + $0x80] sm:$0xff]  ;;  %v62_v34 = vld [vmem:[%s1039_s0 + $0x118] sm:$0xff]  ;;  %v44_v36 = vld [vmem:[%s1039_s0 + $0x88] sm:$0xff]  ;;  %v848_v49 = vsel %vm81_vm5, %v83_v48, %v80_v47 }
  0x1b   :  { %626 = vmatprep.mubr.msk.f32.mxu1 %vm85_vm1, %v51_v11  ;;  %v63_v35 = vld [vmem:[%s1039_s0 + $0x120] sm:$0xff]  ;;  %v45_v37 = vld [vmem:[%s1039_s0 + $0x90] sm:$0xff]  ;;  %v64_v38 = vld [vmem:[%s1039_s0 + $0x128] sm:$0xf] }
  0x1c   :  { %597 = vmatmul.mubr.msk.f32.gmra.mxu0 %vm85_vm1, %v32_v12  ;;  %v46_v39 = vld [vmem:[%s1039_s0 + $0x98] sm:$0xff] }
  0x1d   :  { %599 = vmatprep.mubr.msk.f32.mxu0 %vm85_vm1, %v33_v13 }
  0x1e   :  { %627 = vmatmul.mubr.msk.f32.gmra.mxu1 %vm85_vm1, %v52_v14 }
  0x1f   :  { %629 = vmatprep.mubr.msk.f32.mxu1 %vm85_vm1, %v53_v15 }
  0x20   :  { %600 = vmatmul.mubr.msk.f32.gmra.mxu0 %vm85_vm1, %v34_v16 }
  0x21   :  { %602 = vmatprep.mubr.msk.f32.mxu0 %vm85_vm1, %v35_v17 }
  0x22   :  { %630 = vmatmul.mubr.msk.f32.gmra.mxu1 %vm85_vm1, %v54_v18 }
  0x23   :  { %632 = vmatprep.mubr.msk.f32.mxu1 %vm85_vm1, %v55_v19 }
  0x24   :  { %603 = vmatmul.mubr.msk.f32.gmra.mxu0 %vm85_vm1, %v36_v20 }
  0x25   :  { %605 = vmatprep.mubr.msk.f32.mxu0 %vm85_vm1, %v37_v21 }
  0x26   :  { %633 = vmatmul.mubr.msk.f32.gmra.mxu1 %vm85_vm1, %v56_v22 }
  0x27   :  { %635 = vmatprep.mubr.msk.f32.mxu1 %vm85_vm1, %v57_v23 }
  0x28   :  { %606 = vmatmul.mubr.msk.f32.gmra.mxu0 %vm85_vm1, %v38_v24 }
  0x29   :  { %608 = vmatprep.mubr.msk.f32.mxu0 %vm85_vm1, %v39_v25 }
  0x2a   :  { %636 = vmatmul.mubr.msk.f32.gmra.mxu1 %vm85_vm1, %v58_v26 }
  0x2b   :  { %638 = vmatprep.mubr.msk.f32.mxu1 %vm85_vm1, %v59_v27 }
  0x2c   :  { %609 = vmatmul.mubr.msk.f32.gmra.mxu0 %vm85_vm1, %v40_v28 }
  0x2d   :  { %611 = vmatprep.mubr.msk.f32.mxu0 %vm85_vm1, %v41_v29 }
  0x2e   :  { %639 = vmatmul.mubr.msk.f32.gmra.mxu1 %vm85_vm1, %v60_v30 }
  0x2f   :  { %641 = vmatprep.mubr.msk.f32.mxu1 %vm85_vm1, %v61_v31 }
  0x30   :  { %612 = vmatmul.mubr.msk.f32.gmra.mxu0 %vm85_vm1, %v42_v32 }
  0x31   :  { %614 = vmatprep.mubr.msk.f32.mxu0 %vm85_vm1, %v43_v33 }
  0x32   :  { %642 = vmatmul.mubr.msk.f32.gmra.mxu1 %vm85_vm1, %v62_v34 }
  0x33   :  { %644 = vmatprep.mubr.msk.f32.mxu1 %vm85_vm1, %v63_v35 }
  0x34   :  { %615 = vmatmul.mubr.msk.f32.gmra.mxu0 %vm85_vm1, %v44_v36 }
  0x35   :  { %617 = vmatprep.mubr.msk.f32.mxu0 %vm85_vm1, %v45_v37 }
  0x36   :  { %645 = vmatmul.mubr.msk.f32.gmra.mxu1 %vm85_vm1, %v64_v38 }
  0x38   :  { %618 = vmatmul.mubr.msk.f32.gmra.mxu0 %vm85_vm1, %v46_v39 }
  0xd4   :  { %v592_v50 = vpop.f32.mrf.mxu0 }
  0xd5   :  { %v276_v51 = vadd.f32 %v592_v50, %v848_v49 }
  0xd6   :  { %v270_v52 = vpop.f32.mrf.mxu0  ;;  %v622_v53 = vpop.f32.mrf.mxu1 }
  0xd7   :  { %461 = vst.msk [vmem:[%s1042_s3 + $0x8] sm:$0xff] %vm459_vm6, %v276_v51  ;;  %v271_v54 = vadd.f32 %v270_v52, %v848_v49  ;;  %v376_v55 = vadd.f32 %v622_v53, %v848_v49 }
  0xd8   :  { %v595_v56 = vpop.f32.mrf.mxu0  ;;  %v370_v57 = vpop.f32.mrf.mxu1 }
  0xd9   :  { %460 = vst.msk [vmem:[%s1042_s3] sm:$0xff] %vm459_vm6, %v271_v54  ;;  %481 = vst.msk [vmem:[%s1042_s3 + $0xa8] sm:$0xff] %vm459_vm6, %v376_v55  ;;  %v286_v58 = vadd.f32 %v595_v56, %v848_v49  ;;  %v371_v59 = vadd.f32 %v370_v57, %v848_v49 }
  0xda   :  { %v280_v60 = vpop.f32.mrf.mxu0  ;;  %v625_v61 = vpop.f32.mrf.mxu1 }
  0xdb   :  { %463 = vst.msk [vmem:[%s1042_s3 + $0x18] sm:$0xff] %vm459_vm6, %v286_v58  ;;  %480 = vst.msk [vmem:[%s1042_s3 + $0xa0] sm:$0xff] %vm459_vm6, %v371_v59  ;;  %v281_v62 = vadd.f32 %v280_v60, %v848_v49  ;;  %v386_v63 = vadd.f32 %v625_v61, %v848_v49 }
  0xdc   :  { %v598_v0 = vpop.f32.mrf.mxu0  ;;  %v380_v1 = vpop.f32.mrf.mxu1 }
  0xdd   :  { %462 = vst.msk [vmem:[%s1042_s3 + $0x10] sm:$0xff] %vm459_vm6, %v281_v62  ;;  %483 = vst.msk [vmem:[%s1042_s3 + $0xb8] sm:$0xff] %vm459_vm6, %v386_v63  ;;  %v296_v2 = vadd.f32 %v598_v0, %v848_v49  ;;  %v381_v3 = vadd.f32 %v380_v1, %v848_v49 }
  0xde   :  { %v290_v4 = vpop.f32.mrf.mxu0  ;;  %v628_v5 = vpop.f32.mrf.mxu1 }
  0xdf   :  { %465 = vst.msk [vmem:[%s1042_s3 + $0x28] sm:$0xff] %vm459_vm6, %v296_v2  ;;  %482 = vst.msk [vmem:[%s1042_s3 + $0xb0] sm:$0xff] %vm459_vm6, %v381_v3  ;;  %v291_v6 = vadd.f32 %v290_v4, %v848_v49  ;;  %v396_v7 = vadd.f32 %v628_v5, %v848_v49 }
  0xe0   :  { %v601_v8 = vpop.f32.mrf.mxu0  ;;  %v390_v9 = vpop.f32.mrf.mxu1 }
  0xe1   :  { %464 = vst.msk [vmem:[%s1042_s3 + $0x20] sm:$0xff] %vm459_vm6, %v291_v6  ;;  %485 = vst.msk [vmem:[%s1042_s3 + $0xc8] sm:$0xff] %vm459_vm6, %v396_v7  ;;  %v306_v10 = vadd.f32 %v601_v8, %v848_v49  ;;  %v391_v11 = vadd.f32 %v390_v9, %v848_v49 }
  0xe2   :  { %v300_v12 = vpop.f32.mrf.mxu0  ;;  %v631_v13 = vpop.f32.mrf.mxu1 }
  0xe3   :  { %467 = vst.msk [vmem:[%s1042_s3 + $0x38] sm:$0xff] %vm459_vm6, %v306_v10  ;;  %484 = vst.msk [vmem:[%s1042_s3 + $0xc0] sm:$0xff] %vm459_vm6, %v391_v11  ;;  %v301_v14 = vadd.f32 %v300_v12, %v848_v49  ;;  %v406_v15 = vadd.f32 %v631_v13, %v848_v49 }
  0xe4   :  { %v604_v16 = vpop.f32.mrf.mxu0  ;;  %v400_v17 = vpop.f32.mrf.mxu1 }
  0xe5   :  { %466 = vst.msk [vmem:[%s1042_s3 + $0x30] sm:$0xff] %vm459_vm6, %v301_v14  ;;  %487 = vst.msk [vmem:[%s1042_s3 + $0xd8] sm:$0xff] %vm459_vm6, %v406_v15  ;;  %v316_v18 = vadd.f32 %v604_v16, %v848_v49  ;;  %v401_v19 = vadd.f32 %v400_v17, %v848_v49 }
  0xe6   :  { %v310_v20 = vpop.f32.mrf.mxu0  ;;  %v634_v21 = vpop.f32.mrf.mxu1 }
  0xe7   :  { %469 = vst.msk [vmem:[%s1042_s3 + $0x48] sm:$0xff] %vm459_vm6, %v316_v18  ;;  %486 = vst.msk [vmem:[%s1042_s3 + $0xd0] sm:$0xff] %vm459_vm6, %v401_v19  ;;  %v311_v22 = vadd.f32 %v310_v20, %v848_v49  ;;  %v416_v23 = vadd.f32 %v634_v21, %v848_v49 }
  0xe8   :  { %v607_v24 = vpop.f32.mrf.mxu0  ;;  %v410_v25 = vpop.f32.mrf.mxu1 }
  0xe9   :  { %468 = vst.msk [vmem:[%s1042_s3 + $0x40] sm:$0xff] %vm459_vm6, %v311_v22  ;;  %489 = vst.msk [vmem:[%s1042_s3 + $0xe8] sm:$0xff] %vm459_vm6, %v416_v23  ;;  %v326_v26 = vadd.f32 %v607_v24, %v848_v49  ;;  %v411_v27 = vadd.f32 %v410_v25, %v848_v49 }
  0xea   :  { %v320_v28 = vpop.f32.mrf.mxu0  ;;  %v637_v29 = vpop.f32.mrf.mxu1 }
  0xeb   :  { %471 = vst.msk [vmem:[%s1042_s3 + $0x58] sm:$0xff] %vm459_vm6, %v326_v26  ;;  %488 = vst.msk [vmem:[%s1042_s3 + $0xe0] sm:$0xff] %vm459_vm6, %v411_v27  ;;  %v321_v30 = vadd.f32 %v320_v28, %v848_v49  ;;  %v426_v31 = vadd.f32 %v637_v29, %v848_v49 }
  0xec   :  { %v610_v32 = vpop.f32.mrf.mxu0  ;;  %v420_v33 = vpop.f32.mrf.mxu1 }
  0xed   :  { %470 = vst.msk [vmem:[%s1042_s3 + $0x50] sm:$0xff] %vm459_vm6, %v321_v30  ;;  %491 = vst.msk [vmem:[%s1042_s3 + $0xf8] sm:$0xff] %vm459_vm6, %v426_v31  ;;  %v336_v34 = vadd.f32 %v610_v32, %v848_v49  ;;  %v421_v35 = vadd.f32 %v420_v33, %v848_v49 }
  0xee   :  { %v330_v36 = vpop.f32.mrf.mxu0  ;;  %v640_v37 = vpop.f32.mrf.mxu1 }
  0xef   :  { %473 = vst.msk [vmem:[%s1042_s3 + $0x68] sm:$0xff] %vm459_vm6, %v336_v34  ;;  %490 = vst.msk [vmem:[%s1042_s3 + $0xf0] sm:$0xff] %vm459_vm6, %v421_v35  ;;  %v331_v38 = vadd.f32 %v330_v36, %v848_v49  ;;  %v436_v39 = vadd.f32 %v640_v37, %v848_v49 }
  0xf0   :  { %v613_v40 = vpop.f32.mrf.mxu0  ;;  %v430_v41 = vpop.f32.mrf.mxu1 }
  0xf1   :  { %472 = vst.msk [vmem:[%s1042_s3 + $0x60] sm:$0xff] %vm459_vm6, %v331_v38  ;;  %493 = vst.msk [vmem:[%s1042_s3 + $0x108] sm:$0xff] %vm459_vm6, %v436_v39  ;;  %v346_v42 = vadd.f32 %v613_v40, %v848_v49  ;;  %v431_v43 = vadd.f32 %v430_v41, %v848_v49 }
  0xf2   :  { %v340_v44 = vpop.f32.mrf.mxu0  ;;  %v643_v45 = vpop.f32.mrf.mxu1 }
  0xf3   :  { %475 = vst.msk [vmem:[%s1042_s3 + $0x78] sm:$0xff] %vm459_vm6, %v346_v42  ;;  %492 = vst.msk [vmem:[%s1042_s3 + $0x100] sm:$0xff] %vm459_vm6, %v431_v43  ;;  %v341_v46 = vadd.f32 %v340_v44, %v848_v49  ;;  %v446_v47 = vadd.f32 %v643_v45, %v848_v49 }
  0xf4   :  { %v616_v48 = vpop.f32.mrf.mxu0  ;;  %v440_v50 = vpop.f32.mrf.mxu1 }
  0xf5   :  { %474 = vst.msk [vmem:[%s1042_s3 + $0x70] sm:$0xff] %vm459_vm6, %v341_v46  ;;  %495 = vst.msk [vmem:[%s1042_s3 + $0x118] sm:$0xff] %vm459_vm6, %v446_v47  ;;  %v356_v51 = vadd.f32 %v616_v48, %v848_v49  ;;  %v441_v52 = vadd.f32 %v440_v50, %v848_v49 }
  0xf6   :  { %v350_v53 = vpop.f32.mrf.mxu0  ;;  %v646_v54 = vpop.f32.mrf.mxu1 }
  0xf7   :  { %477 = vst.msk [vmem:[%s1042_s3 + $0x88] sm:$0xff] %vm459_vm6, %v356_v51  ;;  %494 = vst.msk [vmem:[%s1042_s3 + $0x110] sm:$0xff] %vm459_vm6, %v441_v52  ;;  %v351_v55 = vadd.f32 %v350_v53, %v848_v49  ;;  %v456_v56 = vadd.f32 %v646_v54, %v848_v49 }
  0xf8   :  { %v619_v57 = vpop.f32.mrf.mxu0  ;;  %v450_v58 = vpop.f32.mrf.mxu1 }
  0xf9   :  { %476 = vst.msk [vmem:[%s1042_s3 + $0x80] sm:$0xff] %vm459_vm6, %v351_v55  ;;  %v366_v59 = vadd.f32 %v619_v57, %v848_v49  ;;  %v451_v60 = vadd.f32 %v450_v58, %v848_v49 }
  0xfa   :  { %498 = vst.msk [vmem:[%s1042_s3 + $0x128] sm:$0xf] %vm497_vm7, %v456_v56  ;;  %v360_v61 = vpop.f32.mrf.mxu0 }
  0xfb   :  { %479 = vst.msk [vmem:[%s1042_s3 + $0x98] sm:$0xff] %vm459_vm6, %v366_v59  ;;  %496 = vst.msk [vmem:[%s1042_s3 + $0x120] sm:$0xff] %vm459_vm6, %v451_v60  ;;  %v361_v62 = vadd.f32 %v360_v61, %v848_v49 }
  0xfd   :  { %478 = vst.msk [vmem:[%s1042_s3 + $0x90] sm:$0xff] %vm459_vm6, %v361_v62 }
  0xfe   :  { %503 = vsyncpa [#allocation3], 1 }

</bundles_post_ra>
